<compile_context>
chip_gen: v5e
topology: v5e:2x2
jax: 0.10.0
libtpu: 0.0.40
codegen_flags: <defaults>
</compile_context>

<pallas_src>
import jax
import jax.numpy as jnp
from jax.experimental import pallas as pl
from jax.experimental.pallas import tpu as pltpu


def _hardswish_kernel(x_ref, o_ref):
    x = x_ref[...]
    xf = x.astype(jnp.float32)
    # surrogate_hardswish: x * ReLU(x + 3) / 6   (plain ReLU, no clamp at 6)
    o_ref[...] = (xf * jnp.maximum(xf + 3.0, 0.0) * (1.0 / 6.0)).astype(o_ref.dtype)


_MAX_LANES = 1024
_TARGET_TILE_BYTES = 8 * 1024 * 1024     # ~8 MiB tiles (v7x wants 4-8 MiB; fine on v5e/v6e)
_MEGACORE_MIN_BYTES = 2 * 1024 * 1024    # only force grid>=2 when the array is big enough


def _sublane_multiple(itemsize):
    # Native packed tile depth: 8 for f32, 16 for bf16, 32 for int8/fp8.
    return max(8, 32 // itemsize)


def _pick_aligned_lanes(n):
    """Largest multiple of 128 (<= _MAX_LANES) that divides n exactly, else None."""
    lanes = _MAX_LANES
    while lanes >= 128:
        if n % lanes == 0:
            return lanes
        lanes -= 128
    return None


def _pick_block_rows(rows, lanes, itemsize, sub):
    target_rows = max(sub, (_TARGET_TILE_BYTES // (lanes * itemsize)) // sub * sub)
    block_rows = rows if rows <= target_rows else target_rows
    # Keep both v7x TensorCores busy: split into >= 2 blocks for non-trivial arrays.
    if block_rows >= rows and rows * lanes * itemsize >= _MEGACORE_MIN_BYTES:
        half = pl.cdiv(rows, 2)
        block_rows = min(rows, pl.cdiv(half, sub) * sub)
    return block_rows


def _run_kernel(x2d, itemsize):
    rows, lanes = x2d.shape
    sub = _sublane_multiple(itemsize)
    block_rows = _pick_block_rows(rows, lanes, itemsize, sub)
    grid = (pl.cdiv(rows, block_rows),)

    tile_bytes = block_rows * lanes * itemsize
    # double-buffered in + out (4 tiles) + headroom, capped for v7x's 64 MiB VMEM/TC
    vmem_limit = min(48 * 1024 * 1024,
                     max(16 * 1024 * 1024, 4 * tile_bytes + 8 * 1024 * 1024))

    cost = pl.CostEstimate(
        flops=3 * rows * lanes,
        transcendentals=0,
        bytes_accessed=2 * rows * lanes * itemsize,
    )

    return pl.pallas_call(
        _hardswish_kernel,
        out_shape=jax.ShapeDtypeStruct((rows, lanes), x2d.dtype),
        grid=grid,
        in_specs=[pl.BlockSpec((block_rows, lanes), lambda i: (i, 0))],
        out_specs=pl.BlockSpec((block_rows, lanes), lambda i: (i, 0)),
        compiler_params=pltpu.CompilerParams(
            dimension_semantics=("parallel",),
            vmem_limit_bytes=vmem_limit,
        ),
        cost_estimate=cost,
    )(x2d)


def surrogate_hardswish_forward(x):
    """Elementwise surrogate-hardswish on an array of any shape/dtype."""
    orig_shape = x.shape
    n = x.size
    if n == 0:
        return x
    itemsize = jnp.dtype(x.dtype).itemsize

    lanes = _pick_aligned_lanes(n)
    if lanes is not None:
        # Fast path: free reshape, no pad, no slice -> exactly one HBM read pass
        # and one write pass.  Partial final row-block is masked by Pallas.
        out2d = _run_kernel(x.reshape(n // lanes, lanes), itemsize)
        return out2d.reshape(orig_shape)

    # Ragged fallback (n not a multiple of 128): pad only up to one lane multiple,
    # run, and slice the tail off.  Zero padding is safe: f(0) == 0.
    sub = _sublane_multiple(itemsize)
    lanes = _MAX_LANES
    while lanes > 128 and n < lanes * sub:
        lanes //= 2
    rows = pl.cdiv(n, lanes)
    x_flat = jnp.pad(x.reshape(-1), (0, rows * lanes - n))
    out2d = _run_kernel(x_flat.reshape(rows, lanes), itemsize)
    return out2d.reshape(-1)[:n].reshape(orig_shape)


def _reference(x):
    """Pure-JAX reference of the same math."""
    xf = x.astype(jnp.float32)
    return (xf * jnp.maximum(xf + 3.0, 0.0) / 6.0).astype(x.dtype)


if __name__ == "__main__":
    key = jax.random.PRNGKey(0)

    # Main check: shape consistent with a small conv activation (NCHW).
    B, C, H, W = 2, 4, 16, 16
    x = jax.random.normal(key, (B, C, H, W), dtype=jnp.float32) * 4.0
    out = jax.block_until_ready(surrogate_hardswish_forward(x))
    ref = _reference(x)
    assert out.shape == x.shape and out.dtype == x.dtype
    assert jnp.allclose(out, ref, atol=1e-6, rtol=1e-6)

    # Ragged-size sanity check (exercises the fallback path).
    x2 = jax.random.normal(jax.random.PRNGKey(1), (5, 7, 9), dtype=jnp.float32) * 4.0
    out2 = jax.block_until_ready(surrogate_hardswish_forward(x2))
    assert jnp.allclose(out2, _reference(x2), atol=1e-6, rtol=1e-6)

    print("KERNEL_OK")
</pallas_src>

<mosaic_0001>
module attributes {stable_mosaic.version = 11 : i64} {
  func.func @_hardswish_kernel(%arg0: i32, %arg1: memref<2x1024xf32, #tpu.memory_space<vmem>>, %arg2: memref<2x1024xf32, #tpu.memory_space<vmem>>) attributes {dimension_semantics = [#tpu.dimension_semantics<parallel>], iteration_bounds = array<i64: 1>, scalar_prefetch = 0 : i64, scratch_operands = 0 : i64, tpu.core_type = #tpu.core_type<tc>, window_params = [{transform_indices = @transform_0, window_bounds = array<i64: 2, 1024>}, {transform_indices = @transform_1, window_bounds = array<i64: 2, 1024>}]} {
    %c0 = arith.constant 0 : index
    %c0_0 = arith.constant 0 : index
    %0 = vector.load %arg1[%c0, %c0_0] : memref<2x1024xf32, #tpu.memory_space<vmem>>, vector<2x1024xf32>
    %cst = arith.constant 3.000000e+00 : f32
    %1 = vector.broadcast %cst : f32 to vector<2x1024xf32>
    %2 = arith.addf %0, %1 : vector<2x1024xf32>
    %cst_1 = arith.constant 0.000000e+00 : f32
    %3 = vector.broadcast %cst_1 : f32 to vector<2x1024xf32>
    %4 = arith.maximumf %2, %3 : vector<2x1024xf32>
    %5 = arith.mulf %0, %4 : vector<2x1024xf32>
    %cst_2 = arith.constant 0.166666672 : f32
    %6 = vector.broadcast %cst_2 : f32 to vector<2x1024xf32>
    %7 = arith.mulf %5, %6 : vector<2x1024xf32>
    %c0_3 = arith.constant 0 : index
    %c0_4 = arith.constant 0 : index
    %8 = vector.load %arg2[%c0_3, %c0_4] : memref<2x1024xf32, #tpu.memory_space<vmem>>, vector<2x1024xf32>
    tpu.vector_store %arg2[%c0_3, %c0_4], %7 {strides = array<i32>} : memref<2x1024xf32, #tpu.memory_space<vmem>>, vector<2x1024xf32>,
    return
  }
  func.func @transform_0(%arg0: i32) -> (i32, i32) {
    %c0_i32 = arith.constant 0 : i32
    %c0_i32_0 = arith.constant 0 : i32
    return %arg0, %c0_i32 : i32, i32
  }
  func.func @transform_1(%arg0: i32) -> (i32, i32) {
    %c0_i32 = arith.constant 0 : i32
    %c0_i32_0 = arith.constant 0 : i32
    return %arg0, %c0_i32 : i32, i32
  }
}

</mosaic_0001>

<bundles_post_ra>
// kernel: tpu_custom_call.1
= control target key start
LH: loop header
LB: loop body
LE: loop exit
PB: predicated region body
PF: predicated region fallthrough
CT: control target
= control target key end

     0   :  { %6 = vsyncpa [#allocation3], 0  ;;  %s124_s0 = inlined_call_operand.hbm [shape: f32[2,1024], index: 0, kind: input, shape index: {}]   ;;  %s125_s1 = inlined_call_operand.hbm [shape: f32[2,1024], index: 1, kind: output, shape index: {}]  }
   0x1   :  { %7 = vsyncpa [#allocation4], 0  ;;  %s13_s8 = sshll.u32 %s124_s0, 4  ;;  %s106_s9 = smov [#allocation2]   ;;  %s14_s8 = int_to_ptr.hbm [resolvable:$true] %s13_s8 }
   0x2   :  { %s15_s10 = sshll.u32 %s106_s9, 4  ;;  %s16_s10 = int_to_ptr.vmem [resolvable:$true] %s15_s10 }
   0x3   :  { %18 = dma.hbm_to_vmem [thread:$0]  %s14_s8, 256, %s16_s10, [#allocation3]  }
   0x4   :  { %102 = dma.done.wait [#allocation3], 256  }
   0x5   :  { %103 = vsyncadd [#allocation3], 4294967040  ;;  %v23_v0 = vld [vmem:[#allocation2] sm:$0xff]  ;;  %v24_v1 = vld [vmem:[#allocation2 + $0x8] sm:$0xff]  ;;  %s107_s11 = smov [#allocation5]   ;;  %s42_s0 = sshll.u32 %s125_s1, 4  ;;  %s43_s0 = int_to_ptr.hbm [resolvable:$true] %s42_s0 }
   0x6   :  { %v25_v2 = vadd.f32 3.0, %v23_v0  ;;  %v26_v3 = vadd.f32 3.0, %v24_v1  ;;  %s40_s12 = sshll.u32 %s107_s11, 4  ;;  %s41_s12 = int_to_ptr.vmem [resolvable:$true] %s40_s12 }
   0x8   :  { %v27_v4 = vmax.f32 %v25_v2, 0.0  ;;  %v28_v5 = vmax.f32 %v26_v3, 0.0 }
   0xa   :  { %v29_v6 = vmul.f32 %v27_v4, %v23_v0  ;;  %v30_v7 = vmul.f32 %v28_v5, %v24_v1 }
   0xc   :  { %v31_v8 = vmul.f32 0.16666667, %v29_v6  ;;  %v32_v9 = vmul.f32 0.16666667, %v30_v7 }
   0xe   :  { %33 = vst [vmem:[#allocation5] sm:$0xff] %v31_v8 }
   0xf   :  { %34 = vst [vmem:[#allocation5 + $0x8] sm:$0xff] %v32_v9 }
  0x10   :  { %45 = dma.vmem_to_hbm [thread:$0]  %s41_s12, 256, %s43_s0, [#allocation4]  }
  0x11   :  { %104 = dma.done.wait [#allocation4], 256  }
  0x12   :  { %105 = vsyncadd [#allocation4], 4294967040 }
  0x13   :  { %50 = vsyncpa [#allocation3], 1 }
  0x14   :  { %51 = vsyncpa [#allocation4], 1 }

</bundles_post_ra>
